<compile_context>
chip_gen: v7x
topology: tpu7x:2x2x1
jax: 0.10.0
libtpu: 0.0.40
codegen_flags: <defaults>
</compile_context>

<pallas_src>
import functools

import jax
import jax.numpy as jnp
from jax.experimental import pallas as pl
from jax.experimental.pallas import tpu as pltpu


# ---------------------------------------------------------------------------
# Kernels
# ---------------------------------------------------------------------------
def _matmul_kernel_inplace(x_ref, h_ref, o_ref):
    """K-reduction matmul accumulating directly into the f32 output block.

    First k-step writes the product (no redundant zero-fill store); later
    k-steps accumulate into the resident output tile.
    """
    p = jnp.dot(x_ref[...], h_ref[...], preferred_element_type=jnp.float32)

    @pl.when(pl.program_id(2) == 0)
    def _():
        o_ref[...] = p

    @pl.when(pl.program_id(2) > 0)
    def _():
        o_ref[...] += p


def _matmul_kernel_acc(x_ref, h_ref, o_ref, acc_ref):
    """K-reduction matmul with an f32 VMEM accumulator (non-f32 outputs)."""
    p = jnp.dot(x_ref[...], h_ref[...], preferred_element_type=jnp.float32)

    @pl.when(pl.program_id(2) == 0)
    def _():
        acc_ref[...] = p

    @pl.when(pl.program_id(2) > 0)
    def _():
        acc_ref[...] += p

    @pl.when(pl.program_id(2) == pl.num_programs(2) - 1)
    def _():
        o_ref[...] = acc_ref[...].astype(o_ref.dtype)


# ---------------------------------------------------------------------------
# Device / tile selection
# ---------------------------------------------------------------------------
def _round_up(v, m):
    return (v + m - 1) // m * m


def _device_kind():
    try:
        return jax.devices()[0].device_kind.lower()
    except Exception:
        return ""


def _tpu_generation():
    kind = _device_kind()
    if ("v7" in kind) or ("tpu7" in kind):
        return 7
    if ("v6" in kind) or ("trillium" in kind):
        return 6
    if "v5" in kind:
        return 5
    return 0  # unknown backend (e.g. AOT trace on CPU) -> be conservative


def _vmem_budget_and_limit(gen):
    if gen in (7, 0):
        # v7x: 64 MiB physical VMEM per TC. 40 MiB of tiles under a 48 MiB
        # scoped limit leaves headroom for Mosaic internal scratch, semaphores
        # and DMA descriptors. Unknown backends also get this conservative
        # budget so the compiled kernel is safe on any generation.
        return 40 * 1024 * 1024, 48 * 1024 * 1024
    # v5e / v6e: 128 MiB physical VMEM (scoped default is much lower -> raise).
    return 80 * 1024 * 1024, 100 * 1024 * 1024


def _pick_dim_tile(dim, cap, align):
    """Pick (tile, padded_dim) for one dimension.

    * If the whole dim fits under `cap`, use the full dim (full-dim blocks are
      exempt from the (8,128) divisibility rule) -> no padding, no pad copy.
    * Otherwise pick the aligned tile <= cap that minimizes padding; ties go
      to the larger tile (descending scan).
    """
    if dim <= cap:
        return dim, dim
    cap = max(align, (cap // align) * align)
    best_t, best_pad = cap, _round_up(dim, cap) - dim
    t = cap
    while t >= align:
        pad = _round_up(dim, t) - dim
        if pad == 0:
            return t, dim
        if pad < best_pad:
            best_t, best_pad = t, pad
        t -= align
    return best_t, dim + best_pad


def _shrink_dim(dim, cur_tile, align):
    new_cap = max(align, ((cur_tile // 2) // align) * align)
    return _pick_dim_tile(dim, new_cap, align)


def _choose_tiles(M, K, N, x_bytes, h_bytes, out_bytes, sublane,
                  use_scratch, h_buffers):
    gen = _tpu_generation()
    budget, vmem_limit = _vmem_budget_and_limit(gen)

    # "narrow" = native 16-bit float MXU inputs (bf16/f16).
    # TODO(synk): int8 has no MXU path on v7x (bf16/fp8 only); an explicit
    # bf16 cast / fp8 quantization path would be needed for int inputs there.
    narrow = (x_bytes <= 2 and h_bytes <= 2)

    if gen in (7, 0):
        tm_cap = 1024
        tn_cap = 2048 if narrow else 1024
        tk_cap = 4096 if narrow else 2048
    else:  # v5e / v6e have twice the VMEM -> even bigger tm amortizes H reads
        tm_cap = 2048
        tn_cap = 2048 if narrow else 1024
        tk_cap = 4096 if narrow else 2048

    # v6e / v7x MXUs are 2 x 256x256: prefer 256-step shrinking while large.
    big_mxu = gen in (0, 6, 7)

    tm, Mp = _pick_dim_tile(M, tm_cap, sublane)
    tn, Np = _pick_dim_tile(N, tn_cap, 128)
    tk, Kp = _pick_dim_tile(K, tk_cap, 128)

    def tile_bytes(sub, lane, itemsize):
        # Tiles live in VMEM rounded up to the (8, 128) physical tiling.
        return _round_up(sub, 8) * _round_up(lane, 128) * itemsize

    def vmem_bytes(tm_, tn_, tk_):
        b = (2 * tile_bytes(tm_, tk_, x_bytes)             # double-buffered x
             + h_buffers * tile_bytes(tk_, tn_, h_bytes)   # buffered H
             + 2 * tile_bytes(tm_, tn_, out_bytes))        # double-buffered out
        if use_scratch:                                    # only non-f32 path
            b += tile_bytes(tm_, tn_, 4)
        return b

    # Shrink (tk first, then tn, then tm) until the tiling fits the budget.
    while vmem_bytes(tm, tn, tk) > budget:
        if tk > 512:
            tk, Kp = _shrink_dim(K, tk, 256 if big_mxu else 128)
        elif tn > 256:
            tn, Np = _shrink_dim(N, tn, 256 if (big_mxu and tn > 512) else 128)
        elif tm > 256:
            tm, Mp = _shrink_dim(M, tm, sublane)
        elif tk > 128:
            tk, Kp = _shrink_dim(K, tk, 128)
        elif tn > 128:
            tn, Np = _shrink_dim(N, tn, 128)
        elif tm > sublane:
            tm, Mp = _shrink_dim(M, tm, sublane)
        else:
            break

    # v7x has 2 TensorCores: if the whole problem is a single (i, j) block,
    # split a parallel axis so both cores get work. Prefer splitting M (keeps
    # the per-k-step H DMA volume intact); only halve N when M is too small
    # to split, and never below 256 lanes.
    if gen == 7:
        gi, gj = Mp // tm, Np // tn
        if gi * gj == 1:
            if M >= 2 * sublane:
                tm = _round_up(-(-Mp // 2), sublane)
                Mp = _round_up(M, tm)
            elif tn >= 512:
                new_cap = max(256, (tn // 2 // 128) * 128)
                tn, Np = _pick_dim_tile(N, new_cap, 128)

    return tm, tn, tk, Mp, Kp, Np, vmem_limit


def _make_h_spec(tk, tn, h_buffers):
    """BlockSpec for H; optionally deeper-buffered (opt-in, e.g. h_buffers=3
    for the small-batch HBM-bound regime on v7x). Falls back to the default
    double buffer if this Pallas build lacks pipeline_mode."""
    idx = lambda i, j, k: (k, j)
    if h_buffers > 2:
        try:
            return pl.BlockSpec((tk, tn), idx,
                                pipeline_mode=pl.Buffered(h_buffers))
        except Exception:
            pass
    return pl.BlockSpec((tk, tn), idx)


# ---------------------------------------------------------------------------
# Forward wrapper (== Parametrization.forward)
# ---------------------------------------------------------------------------
@functools.partial(
    jax.jit,
    static_argnames=("tm", "tn", "tk", "force_pallas", "h_buffers"))
def parametrization_forward(x, H, *, tm=None, tn=None, tk=None,
                            force_pallas=False, h_buffers=2):
    """y = x @ H via a tiled Pallas TPU matmul kernel."""
    M, K = x.shape
    K2, N = H.shape
    assert K == K2, f"inner dims mismatch: {K} vs {K2}"

    out_dtype = jnp.result_type(x.dtype, H.dtype)

    # Tiny-problem fast path: fixed pallas_call / per-grid-step overhead
    # dominates there; XLA's fused dot is strictly faster.
    if not force_pallas and 2 * M * N * K < (1 << 24):
        return jnp.dot(x, H).astype(out_dtype)

    x_bytes = jnp.dtype(x.dtype).itemsize
    h_bytes = jnp.dtype(H.dtype).itemsize
    out_bytes = jnp.dtype(out_dtype).itemsize
    # Min sublane tile: 8 for 32-bit, 16 for 16-bit, 32 for 8-bit values.
    sublane = max(8, 32 // x_bytes, 32 // out_bytes)

    use_scratch = out_dtype != jnp.float32

    tm_, tn_, tk_, Mp, Kp, Np, vmem_limit = _choose_tiles(
        M, K, N, x_bytes, h_bytes, out_bytes, sublane, use_scratch,
        max(2, h_buffers))
    if tm is None:
        tm = tm_
    else:
        Mp = _round_up(M, tm)
    if tn is None:
        tn = tn_
    else:
        Np = _round_up(N, tn)
    if tk is None:
        tk = tk_
    else:
        Kp = _round_up(K, tk)

    # Tiles must be (sublane, 128)-aligned unless they span the full dim.
    assert tm % sublane == 0 or tm == M, (tm, M)
    assert tn % 128 == 0 or tn == N, (tn, N)
    assert tk % 128 == 0 or tk == K, (tk, K)

    # Zero-pad only the dims that actually need it (full-dim blocks need no
    # padding at all). Zero K-padding is exact; extra M/N rows/cols are
    # sliced off below.
    # TODO(synk): in a training loop, pre-pad H once outside the step (it is a
    # learned constant) instead of re-materializing the padded copy per call.
    xp = x if (Mp == M and Kp == K) else jnp.pad(x, ((0, Mp - M), (0, Kp - K)))
    Hp = H if (Kp == K and Np == N) else jnp.pad(H, ((0, Kp - K), (0, Np - N)))

    grid = (Mp // tm, Np // tn, Kp // tk)
    gi, gj, _ = grid

    kernel = _matmul_kernel_acc if use_scratch else _matmul_kernel_inplace
    scratch = [pltpu.VMEM((tm, tn), jnp.float32)] if use_scratch else []

    # Truthful (padded, re-streamed) traffic estimate for XLA's scheduler:
    # x is streamed once per j-block, H once per i-block.
    cost = pl.CostEstimate(
        flops=2 * Mp * Np * Kp,
        transcendentals=0,
        bytes_accessed=(gj * Mp * Kp * x_bytes
                        + gi * Kp * Np * h_bytes
                        + Mp * Np * out_bytes),
    )

    yp = pl.pallas_call(
        kernel,
        out_shape=jax.ShapeDtypeStruct((Mp, Np), out_dtype),
        grid_spec=pltpu.PrefetchScalarGridSpec(
            num_scalar_prefetch=0,
            grid=grid,
            in_specs=[
                pl.BlockSpec((tm, tk), lambda i, j, k: (i, k)),
                _make_h_spec(tk, tn, h_buffers),
            ],
            out_specs=pl.BlockSpec((tm, tn), lambda i, j, k: (i, j)),
            scratch_shapes=scratch,
        ),
        compiler_params=pltpu.CompilerParams(
            dimension_semantics=("parallel", "parallel", "arbitrary"),
            vmem_limit_bytes=vmem_limit,
        ),
        cost_estimate=cost,
    )(xp, Hp)

    if Mp == M and Np == N:
        return yp
    return yp[:M, :N]


if __name__ == "__main__":
    key = jax.random.PRNGKey(0)
    kx, kh = jax.random.split(key)

    # Small shapes consistent with the module: x:(batch, inputDim), H:(inputDim, outputDim).
    batch, input_dim, output_dim = 8, 128, 256
    x = jax.random.normal(kx, (batch, input_dim), dtype=jnp.float32)
    # PyTorch inits H to zeros; use non-zero values so the compute path is
    # actually exercised and checkable.
    H = jax.random.normal(kh, (input_dim, output_dim), dtype=jnp.float32)

    # Force the Pallas path (these shapes would otherwise hit the tiny fast path).
    y = jax.block_until_ready(parametrization_forward(x, H, force_pallas=True))
    y_ref = x @ H
    assert y.shape == (batch, output_dim)
    assert jnp.allclose(y, y_ref, atol=1e-4, rtol=1e-4)

    # Non tile-divisible shapes exercise the full-dim (no-padding) block path.
    x2 = jax.random.normal(kx, (5, 100), dtype=jnp.float32)
    H2 = jax.random.normal(kh, (100, 130), dtype=jnp.float32)
    y2 = jax.block_until_ready(parametrization_forward(x2, H2, force_pallas=True))
    assert y2.shape == (5, 130)
    assert jnp.allclose(y2, x2 @ H2, atol=1e-4, rtol=1e-4)

    # bf16 inputs exercise the f32-scratch accumulator kernel.
    xb = x.astype(jnp.bfloat16)
    Hb = H.astype(jnp.bfloat16)
    yb = jax.block_until_ready(parametrization_forward(xb, Hb, force_pallas=True))
    yb_ref = xb.astype(jnp.float32) @ Hb.astype(jnp.float32)
    assert yb.dtype == jnp.bfloat16
    assert jnp.allclose(yb.astype(jnp.float32), yb_ref, atol=0.5, rtol=5e-2)

    # Tiny fast path (plain jnp.dot) also matches.
    y3 = jax.block_until_ready(parametrization_forward(x2, H2))
    assert jnp.allclose(y3, x2 @ H2, atol=1e-4, rtol=1e-4)

    print("KERNEL_OK")
</pallas_src>

<mosaic_0001>
module attributes {stable_mosaic.version = 11 : i64} {
  func.func @_matmul_kernel_inplace(%arg0: i32, %arg1: i32, %arg2: i32, %arg3: memref<8x128xf32, #tpu.memory_space<vmem>>, %arg4: memref<128x256xf32, #tpu.memory_space<vmem>>, %arg5: memref<8x256xf32, #tpu.memory_space<vmem>>) attributes {dimension_semantics = [#tpu.dimension_semantics<parallel>, #tpu.dimension_semantics<parallel>, #tpu.dimension_semantics<arbitrary>], iteration_bounds = array<i64: 1, 1, 1>, scalar_prefetch = 0 : i64, scratch_operands = 0 : i64, tpu.core_type = #tpu.core_type<tc>, window_params = [{transform_indices = @transform_0, window_bounds = array<i64: 8, 128>}, {transform_indices = @transform_1, window_bounds = array<i64: 128, 256>}, {transform_indices = @transform_2, window_bounds = array<i64: 8, 256>}]} {
    %c0 = arith.constant 0 : index
    %c0_0 = arith.constant 0 : index
    %0 = vector.load %arg3[%c0, %c0_0] : memref<8x128xf32, #tpu.memory_space<vmem>>, vector<8x128xf32>
    %c0_1 = arith.constant 0 : index
    %c0_2 = arith.constant 0 : index
    %1 = vector.load %arg4[%c0_1, %c0_2] : memref<128x256xf32, #tpu.memory_space<vmem>>, vector<128x256xf32>
    %cst = arith.constant dense<0.000000e+00> : vector<8x256xf32>
    %2 = tpu.matmul %0, %1, %cst {dimension_numbers = #tpu.dot_dimension_numbers<[1], [0], [0], [1], [0, 0, 1, 1], [], []>} : vector<8x128xf32>, vector<128x256xf32>, vector<8x256xf32> -> vector<8x256xf32>
    %c0_i32 = arith.constant 0 : i32
    %3 = arith.cmpi eq, %arg2, %c0_i32 : i32
    %4 = arith.extui %3 : i1 to i32
    %c0_i32_3 = arith.constant 0 : i32
    %5 = arith.cmpi ne, %4, %c0_i32_3 : i32
    scf.if %5 {
      %c0_6 = arith.constant 0 : index
      %c0_7 = arith.constant 0 : index
      %9 = vector.load %arg5[%c0_6, %c0_7] : memref<8x256xf32, #tpu.memory_space<vmem>>, vector<8x256xf32>
      tpu.vector_store %arg5[%c0_6, %c0_7], %2 {strides = array<i32>} : memref<8x256xf32, #tpu.memory_space<vmem>>, vector<8x256xf32>,
    } else {
    }
    %c0_i32_4 = arith.constant 0 : i32
    %6 = arith.cmpi sgt, %arg2, %c0_i32_4 : i32
    %7 = arith.extui %6 : i1 to i32
    %c0_i32_5 = arith.constant 0 : i32
    %8 = arith.cmpi ne, %7, %c0_i32_5 : i32
    scf.if %8 {
      %c0_6 = arith.constant 0 : index
      %c0_7 = arith.constant 0 : index
      %9 = vector.load %arg5[%c0_6, %c0_7] : memref<8x256xf32, #tpu.memory_space<vmem>>, vector<8x256xf32>
      %10 = arith.addf %9, %2 : vector<8x256xf32>
      %c0_8 = arith.constant 0 : index
      %c0_9 = arith.constant 0 : index
      %11 = vector.load %arg5[%c0_8, %c0_9] : memref<8x256xf32, #tpu.memory_space<vmem>>, vector<8x256xf32>
      tpu.vector_store %arg5[%c0_8, %c0_9], %10 {strides = array<i32>} : memref<8x256xf32, #tpu.memory_space<vmem>>, vector<8x256xf32>,
    } else {
    }
    return
  }
  func.func @transform_0(%arg0: i32, %arg1: i32, %arg2: i32) -> (i32, i32) {
    %c0_i32 = arith.constant 0 : i32
    return %arg0, %arg2 : i32, i32
  }
  func.func @transform_1(%arg0: i32, %arg1: i32, %arg2: i32) -> (i32, i32) {
    %c0_i32 = arith.constant 0 : i32
    return %arg2, %arg1 : i32, i32
  }
  func.func @transform_2(%arg0: i32, %arg1: i32, %arg2: i32) -> (i32, i32) {
    %c0_i32 = arith.constant 0 : i32
    return %arg0, %arg1 : i32, i32
  }
}

</mosaic_0001>

<bundles_post_ra>
// kernel: parametrization_forward.1
= control target key start
LH: loop header
LB: loop body
LE: loop exit
PB: predicated region body
PF: predicated region fallthrough
CT: control target
= control target key end

     0   :  { %7 = vsyncpa [#allocation3], 0  ;;  %s348_s0 = inlined_call_operand.hbm [shape: f32[8,128], index: 0, kind: input, shape index: {}]   ;;  %s349_s1 = inlined_call_operand.hbm [shape: f32[128,256], index: 1, kind: input, shape index: {}]   ;;  %s350_s2 = inlined_call_operand.hbm [shape: f32[8,256], index: 2, kind: output, shape index: {}]  }
   0x1   :  { %8 = vsyncpa [#allocation6], 0 }
   0x2   :  { %9 = vsyncpa [#allocation4], 0  ;;  %s284_s9 = smov [#allocation2]   ;;  %s285_s11 = smov [#allocation5]  }
   0x3   :  { %s16_s10 = sshll.u32 %s284_s9, 4  ;;  %s25_s12 = sshll.u32 %s285_s11, 4  ;;  %s17_s10 = int_to_ptr.vmem [resolvable:$true] %s16_s10  ;;  %s305_s12 = int_to_ptr.vmem [resolvable:$true] %s25_s12 }
   0x4   :  { %s212_s15 = scalar_lea.hbm %s348_s0, 128 }
   0x5   :  { %p213_p0 = scmp.ne.s32.totalorder %s348_s0, %s212_s15  ;;  %p216_p1 = scmp.lt.u32.totalorder %s212_s15, %s348_s0 }
   0x7   :  { %p218_p2 = pnand %p216_p1, %p213_p0 }
   0x9   :  { %221 = shalt.err (!%p218_p2)
}
   0xa   :  { %s222_s20 = scalar_lea.vmem %s17_s10, 128  ;;  %p227_p4 = scmp.lt.s32.totalorder %s17_s10, %s17_s10 }
   0xb   :  { %p223_p3 = scmp.ne.s32.totalorder %s17_s10, %s222_s20  ;;  %p228_p5 = scmp.lt.s32.totalorder %s222_s20, %s222_s20 }
   0xd   :  { %p229_p6 = por %p228_p5, %p227_p4 }
   0xf   :  { %p230_p7 = pnand %p229_p6, %p223_p3 }
  0x11   :  { %233 = shalt.err (!%p230_p7)
}
  0x12   :  { %19 = dma.hbm_to_vmem [thread:$0]  %s348_s0, 128, %s17_s10, [#allocation3]  }
  0x13   :  { %s234_s25 = scalar_lea.hbm %s349_s1, 4096 }
  0x14   :  { %p235_p8 = scmp.ne.s32.totalorder %s349_s1, %s234_s25  ;;  %p238_p9 = scmp.lt.u32.totalorder %s234_s25, %s349_s1 }
  0x16   :  { %p240_p10 = pnand %p238_p9, %p235_p8 }
  0x18   :  { %243 = shalt.err (!%p240_p10)
}
  0x19   :  { %s244_s30 = scalar_lea.vmem %s305_s12, 4096  ;;  %p249_p12 = scmp.lt.s32.totalorder %s305_s12, %s305_s12 }
  0x1a   :  { %p245_p11 = scmp.ne.s32.totalorder %s305_s12, %s244_s30  ;;  %p250_p13 = scmp.lt.s32.totalorder %s244_s30, %s244_s30 }
  0x1c   :  { %p251_p0 = por %p250_p13, %p249_p12 }
  0x1e   :  { %p252_p1 = pnand %p251_p0, %p245_p11 }
  0x20   :  { %255 = shalt.err (!%p252_p1)
}
  0x21   :  { %s286_s0 = smov 256   ;;  %s287_s3 = smov 16  }
  0x22   :  { %31 = dma.hbm_to_vmem [thread:$0]  %s349_s1, 4096, %s305_s12, [#allocation6], %s286_s0, %s286_s0, %s287_s3  }
  0x23   :  { %278 = dma.done.wait [#allocation3], 128  }
  0x24   :  { %279 = vsyncadd [#allocation3], 4294967168 }
  0x25   :  { %280 = dma.done.wait [#allocation6], 4096  }
  0x26   :  { %281 = vsyncadd [#allocation6], 4294963200  ;;  %v288_v0 = vmov 0.0   ;;  %v40_v1 = vld [vmem:[#allocation5 + $0x8] sm:$0xff]  ;;  %v42_v2 = vld [vmem:[#allocation5 + $0x18] sm:$0xff]  ;;  %s289_s1 = smov [#allocation7]  }
  0x27   :  { %135 = vmatprep.mubr.f32.mxu0 %v288_v0  ;;  %v39_v3 = vld [vmem:[#allocation5] sm:$0xff]  ;;  %v174_v4 = vpack.c.bf16 %v42_v2, %v40_v1  ;;  %v41_v5 = vld [vmem:[#allocation5 + $0x10] sm:$0xff]  ;;  %v44_v6 = vld [vmem:[#allocation5 + $0x28] sm:$0xff]  ;;  %s164_s6 = sshll.u32 %s289_s1, 4  ;;  %s165_s6 = int_to_ptr.vmem [resolvable:$true] %s164_s6 }
  0x28   :  { %v46_v7 = vld [vmem:[#allocation5 + $0x38] sm:$0xff]  ;;  %v176_v8 = vpack.c.bf16 %v41_v5, %v39_v3  ;;  %v43_v10 = vld [vmem:[#allocation5 + $0x20] sm:$0xff]  ;;  %v45_v11 = vld [vmem:[#allocation5 + $0x30] sm:$0xff]  ;;  %s256_s7 = scalar_lea.vmem %s165_s6, 256  ;;  %p261_p3 = scmp.lt.s32.totalorder %s165_s6, %s165_s6 }
  0x29   :  { %v178_v9 = vpack.c.bf16 %v46_v7, %v44_v6  ;;  %v48_v12 = vld [vmem:[#allocation5 + $0x48] sm:$0xff]  ;;  %175 = vmatprep.subr.bf16.mxu0 %v174_v4  ;;  %v50_v13 = vld [vmem:[#allocation5 + $0x58] sm:$0xff]  ;;  %v180_v14 = vpack.c.bf16 %v45_v11, %v43_v10  ;;  %v47_v16 = vld [vmem:[#allocation5 + $0x40] sm:$0xff]  ;;  %p257_p2 = scmp.ne.s32.totalorder %s165_s6, %s256_s7  ;;  %p262_p4 = scmp.lt.s32.totalorder %s256_s7, %s256_s7 }
  0x2a   :  { %177 = vmatpush1.bf16.msra.mxu0 %v176_v8  ;;  %v182_v15 = vpack.c.bf16 %v50_v13, %v48_v12  ;;  %v49_v17 = vld [vmem:[#allocation5 + $0x50] sm:$0xff]  ;;  %v52_v18 = vld [vmem:[#allocation5 + $0x68] sm:$0xff]  ;;  %v54_v19 = vld [vmem:[#allocation5 + $0x78] sm:$0xff] }
  0x2b   :  { %179 = vmatprep.subr.bf16.mxu0 %v178_v9  ;;  %v184_v20 = vpack.c.bf16 %v49_v17, %v47_v16  ;;  %v186_v21 = vpack.c.bf16 %v54_v19, %v52_v18  ;;  %v51_v22 = vld [vmem:[#allocation5 + $0x60] sm:$0xff]  ;;  %v53_v23 = vld [vmem:[#allocation5 + $0x70] sm:$0xff]  ;;  %v56_v24 = vld [vmem:[#allocation5 + $0x88] sm:$0xff]  ;;  %p263_p5 = por %p262_p4, %p261_p3 }
  0x2c   :  { %v58_v25 = vld [vmem:[#allocation5 + $0x98] sm:$0xff]  ;;  %v188_v26 = vpack.c.bf16 %v53_v23, %v51_v22  ;;  %v55_v28 = vld [vmem:[#allocation5 + $0x80] sm:$0xff]  ;;  %v57_v29 = vld [vmem:[#allocation5 + $0x90] sm:$0xff] }
  0x2d   :  { %v190_v27 = vpack.c.bf16 %v58_v25, %v56_v24  ;;  %v60_v30 = vld [vmem:[#allocation5 + $0xa8] sm:$0xff]  ;;  %v62_v31 = vld [vmem:[#allocation5 + $0xb8] sm:$0xff]  ;;  %v192_v32 = vpack.c.bf16 %v57_v29, %v55_v28  ;;  %v59_v34 = vld [vmem:[#allocation5 + $0xa0] sm:$0xff]  ;;  %p264_p6 = pnand %p263_p5, %p257_p2 }
  0x2e   :  { %181 = vmatpush1.bf16.msra.mxu0 %v180_v14  ;;  %v194_v33 = vpack.c.bf16 %v62_v31, %v60_v30  ;;  %v61_v35 = vld [vmem:[#allocation5 + $0xb0] sm:$0xff]  ;;  %v64_v36 = vld [vmem:[#allocation5 + $0xc8] sm:$0xff]  ;;  %v66_v37 = vld [vmem:[#allocation5 + $0xd8] sm:$0xff] }
  0x2f   :  { %183 = vmatprep.subr.bf16.mxu0 %v182_v15  ;;  %v196_v38 = vpack.c.bf16 %v61_v35, %v59_v34  ;;  %v198_v39 = vpack.c.bf16 %v66_v37, %v64_v36  ;;  %v63_v40 = vld [vmem:[#allocation5 + $0xc0] sm:$0xff]  ;;  %v65_v41 = vld [vmem:[#allocation5 + $0xd0] sm:$0xff]  ;;  %v68_v42 = vld [vmem:[#allocation5 + $0xe8] sm:$0xff] }
  0x30   :  { %v70_v43 = vld [vmem:[#allocation5 + $0xf8] sm:$0xff]  ;;  %v200_v44 = vpack.c.bf16 %v65_v41, %v63_v40  ;;  %v67_v46 = vld [vmem:[#allocation5 + $0xe0] sm:$0xff]  ;;  %v69_v47 = vld [vmem:[#allocation5 + $0xf0] sm:$0xff] }
  0x31   :  { %v202_v45 = vpack.c.bf16 %v70_v43, %v68_v42  ;;  %v204_v48 = vpack.c.bf16 %v69_v47, %v67_v46  ;;  %v38_v49 = vld [vmem:[#allocation2] sm:$0xff] }
  0x32   :  { %185 = vmatpush1.bf16.msra.mxu0 %v184_v20 }
  0x33   :  { %187 = vmatprep.subr.bf16.mxu0 %v186_v21 }
  0x36   :  { %189 = vmatpush1.bf16.msra.mxu0 %v188_v26 }
  0x37   :  { %191 = vmatprep.subr.bf16.mxu0 %v190_v27 }
  0x3a   :  { %193 = vmatpush1.bf16.msra.mxu0 %v192_v32 }
  0x3b   :  { %195 = vmatprep.subr.bf16.mxu0 %v194_v33 }
  0x3e   :  { %197 = vmatpush1.bf16.msra.mxu0 %v196_v38 }
  0x3f   :  { %199 = vmatprep.subr.bf16.mxu0 %v198_v39 }
  0x42   :  { %201 = vmatpush1.bf16.msra.mxu0 %v200_v44 }
  0x43   :  { %203 = vmatprep.subr.bf16.mxu0 %v202_v45 }
  0x46   :  { %205 = vmatpush1.bf16.msra.mxu0 %v204_v48 }
  0x49   :  { %136 = vmatmul.mubr.f32.vlgmr.msra.gmra.mrb[0].mxu0 %v38_v49 }
 0x11c   :  { %v137_v50 = vpop.f32.mrb[0].mxu0 }
 0x11d   :  { %146 = vst [vmem:[#allocation7] sm:$0xff] %v137_v50  ;;  %v139_v51 = vpop.f32.mrb[1].mxu0 }
 0x11e   :  { %147 = vst [vmem:[#allocation7 + $0x8] sm:$0xff] %v139_v51 }
 0x11f   :  { %267 = shalt.err (!%p264_p6)
}
 0x120   :  { %s268_s10 = scalar_lea.hbm %s350_s2, 256 }
 0x121   :  { %p269_p7 = scmp.ne.s32.totalorder %s350_s2, %s268_s10  ;;  %p272_p8 = scmp.lt.u32.totalorder %s268_s10, %s350_s2 }
 0x123   :  { %p274_p9 = pnand %p272_p8, %p269_p7 }
 0x125   :  { %277 = shalt.err (!%p274_p9)
}
 0x126   :  { %167 = dma.vmem_to_hbm [thread:$0]  %s165_s6, 256, %s350_s2, [#allocation4]  }
 0x127   :  { %282 = dma.done.wait [#allocation4], 256  }
 0x128   :  { %283 = vsyncadd [#allocation4], 4294967040 }
 0x129   :  { %171 = vsyncpa [#allocation3], 1 }
 0x12a   :  { %172 = vsyncpa [#allocation6], 1 }
 0x12b   :  { %173 = vsyncpa [#allocation4], 1 }

</bundles_post_ra>
